<compile_context>
chip_gen: v6e
topology: v6e:2x2x1
jax: 0.10.0
libtpu: 0.0.40
codegen_flags: <defaults>
</compile_context>

<pallas_src>
import jax
import jax.numpy as jnp
from jax.experimental import pallas as pl
from jax.experimental.pallas import tpu as pltpu  # noqa: F401  (TPU backend assumed)


def duelling_dqn_kernel(x_ref,                     # [B, obs]   f32
                        w1_ref, b1_ref,            # [obs, H] f32 / [1, H] f32 (VPU path)
                        w2_ref, b2_ref,            # [H, H] bf16 / [1, H] f32
                        w_va1_ref, b_va1_ref,      # fused [H, 2H] bf16 / [1, 2H] f32
                        w_fin_ref,                 # packed [1, 2H] f32 = [wv2 | wa2]
                        bv2_ref, ba2_ref,          # [1, 1] f32 each
                        q_ref):                    # [B, 128] f32 lane-dense slab
    H = w2_ref.shape[0]
    x = x_ref[...]                                 # [B, obs] f32
    obs = x.shape[1]

    # ---- common layer 1 on the VPU: K=obs(=2) contraction as broadcast FMAs.
    pre = x[:, 0:1] * w1_ref[0:1, :]               # [B,1] * [1,H] -> [B,H]
    for k in range(1, obs):                        # static, tiny (obs=2)
        pre = pre + x[:, k:k + 1] * w1_ref[k:k + 1, :]
    h = jnp.maximum(pre + b1_ref[...], 0.0)        # [B, H] f32

    # ---- common layer 2 on the MXU (bf16 operands, f32 accumulation).
    h = jnp.dot(h.astype(jnp.bfloat16), w2_ref[...],
                preferred_element_type=jnp.float32) + b2_ref[...]
    h = jnp.maximum(h, 0.0)                        # [B, H] f32

    # ---- fused value|advantage hidden layers: ONE [H, 2H] matmul.
    va = jnp.dot(h.astype(jnp.bfloat16), w_va1_ref[...],
                 preferred_element_type=jnp.float32) + b_va1_ref[...]
    va = jnp.maximum(va, 0.0)                      # [B, 2H]; [:, :H]=value, [:, H:]=adv

    # ---- final H->1 projections as VPU multiply + lane reductions (no N=1 matmuls).
    t = va * w_fin_ref[...]                        # [B, 2H] f32
    v = jnp.sum(t[:, :H], axis=-1, keepdims=True) + bv2_ref[...]   # [B, 1]
    a = jnp.sum(t[:, H:], axis=-1, keepdims=True) + ba2_ref[...]   # [B, 1]

    # ---- duelling combine: mean over the whole advantage tensor (scalar), in f32.
    q = v + (a - jnp.mean(a))                      # [B, 1]

    # Lane-dense store: broadcast into the [B, 128] slab; wrapper slices column 0.
    q_ref[...] = jnp.broadcast_to(q, q_ref.shape)


def duelling_dqn_forward(x, kp):
    """x: [B, obs] f32; kp: packed kernel params (see pack_kernel_params)."""
    B = x.shape[0]
    q_slab = pl.pallas_call(
        duelling_dqn_kernel,
        out_shape=jax.ShapeDtypeStruct((B, 128), jnp.float32),
    )(x,
      kp["w1"], kp["b1"],
      kp["w2"], kp["b2"],
      kp["w_va1"], kp["b_va1"],
      kp["w_fin"], kp["bv2"], kp["ba2"])
    return q_slab[:, :1]                           # [B, 1]


def init_params(key, obs=2, hidden=256):
    """Match the module's init: weights ~ N(0,1); biases keep the torch Linear default
    uniform(-1/sqrt(fan_in), 1/sqrt(fan_in)). Weights stored pre-transposed [in, out]."""
    ks = jax.random.split(key, 12)

    def lin(kw, kb, fan_in, fan_out):
        w = jax.random.normal(kw, (fan_out, fan_in), dtype=jnp.float32).T   # [in, out]
        bound = 1.0 / (fan_in ** 0.5)
        b = jax.random.uniform(kb, (1, fan_out), dtype=jnp.float32,
                               minval=-bound, maxval=bound)
        return w, b

    p = {}
    p["w1"],  p["b1"]  = lin(ks[0],  ks[1],  obs,    hidden)
    p["w2"],  p["b2"]  = lin(ks[2],  ks[3],  hidden, hidden)
    p["wv1"], p["bv1"] = lin(ks[4],  ks[5],  hidden, hidden)
    p["wv2"], p["bv2"] = lin(ks[6],  ks[7],  hidden, 1)
    p["wa1"], p["ba1"] = lin(ks[8],  ks[9],  hidden, hidden)
    p["wa2"], p["ba2"] = lin(ks[10], ks[11], hidden, 1)
    return p


def pack_kernel_params(p):
    """Fuse/cast the f32 reference params into the kernel's packed layout."""
    return {
        "w1": p["w1"],                                        # [obs, H] f32 (VPU path)
        "b1": p["b1"],                                        # [1, H]   f32
        "w2": p["w2"].astype(jnp.bfloat16),                   # [H, H]   bf16
        "b2": p["b2"],                                        # [1, H]   f32
        "w_va1": jnp.concatenate([p["wv1"], p["wa1"]], axis=1).astype(jnp.bfloat16),
        "b_va1": jnp.concatenate([p["bv1"], p["ba1"]], axis=1),        # [1, 2H] f32
        "w_fin": jnp.concatenate([p["wv2"], p["wa2"]], axis=0).T,      # [1, 2H] f32
        "bv2": p["bv2"],                                      # [1, 1] f32
        "ba2": p["ba2"],                                      # [1, 1] f32
    }


def reference_forward(x, p):
    """Pure-JAX f32 reference of the PyTorch forward."""
    relu = lambda z: jnp.maximum(z, 0.0)
    h = relu(x @ p["w1"] + p["b1"])
    h = relu(h @ p["w2"] + p["b2"])
    v = relu(h @ p["wv1"] + p["bv1"]) @ p["wv2"] + p["bv2"]
    a = relu(h @ p["wa1"] + p["ba1"]) @ p["wa2"] + p["ba2"]
    return v + (a - jnp.mean(a))


if __name__ == "__main__":
    B, OBS, HIDDEN = 8, 2, 256   # module defaults: obs=2, hidden=256; small batch
    key = jax.random.PRNGKey(0)
    k_x, k_p = jax.random.split(key)

    x = jax.random.normal(k_x, (B, OBS), dtype=jnp.float32)
    params = init_params(k_p, obs=OBS, hidden=HIDDEN)
    kparams = pack_kernel_params(params)

    q = duelling_dqn_forward(x, kparams)
    q = jax.block_until_ready(q)

    q_ref = reference_forward(x, params)
    assert q.shape == (B, 1)
    # bf16 hidden layers vs f32 reference: use a max-abs-normalized tolerance.
    scale = jnp.max(jnp.abs(q_ref))
    err = jnp.max(jnp.abs(q - q_ref))
    assert err <= 0.05 * scale + 1.0, f"mismatch vs JAX reference: err={err}, scale={scale}"

    print("KERNEL_OK")
</pallas_src>

<mosaic_0001>
module attributes {stable_mosaic.version = 11 : i64} {
  func.func @duelling_dqn_kernel(%arg0: memref<8x2xf32, #tpu.memory_space<vmem>>, %arg1: memref<2x256xf32, #tpu.memory_space<vmem>>, %arg2: memref<1x256xf32, #tpu.memory_space<vmem>>, %arg3: memref<256x256xbf16, #tpu.memory_space<vmem>>, %arg4: memref<1x256xf32, #tpu.memory_space<vmem>>, %arg5: memref<256x512xbf16, #tpu.memory_space<vmem>>, %arg6: memref<1x512xf32, #tpu.memory_space<vmem>>, %arg7: memref<1x512xf32, #tpu.memory_space<vmem>>, %arg8: memref<1x1xf32, #tpu.memory_space<vmem>>, %arg9: memref<1x1xf32, #tpu.memory_space<vmem>>, %arg10: memref<8x128xf32, #tpu.memory_space<vmem>>) attributes {dimension_semantics = [], scalar_prefetch = 0 : i64, scratch_operands = 0 : i64, tpu.core_type = #tpu.core_type<tc>} {
    %c0 = arith.constant 0 : index
    %c0_0 = arith.constant 0 : index
    %0 = vector.load %arg0[%c0, %c0_0] : memref<8x2xf32, #tpu.memory_space<vmem>>, vector<8x2xf32>
    %1 = vector.extract_strided_slice %0 {offsets = [0, 0], sizes = [8, 1], strides = [1, 1]} : vector<8x2xf32> to vector<8x1xf32>
    %c0_1 = arith.constant 0 : index
    %c0_2 = arith.constant 0 : index
    %2 = vector.load %arg1[%c0_1, %c0_2] : memref<2x256xf32, #tpu.memory_space<vmem>>, vector<1x256xf32>
    %3 = vector.broadcast %1 : vector<8x1xf32> to vector<8x256xf32>
    %4 = vector.broadcast %2 : vector<1x256xf32> to vector<8x256xf32>
    %5 = arith.mulf %3, %4 : vector<8x256xf32>
    %6 = vector.extract_strided_slice %0 {offsets = [0, 1], sizes = [8, 1], strides = [1, 1]} : vector<8x2xf32> to vector<8x1xf32>
    %c1 = arith.constant 1 : index
    %c0_3 = arith.constant 0 : index
    %7 = vector.load %arg1[%c1, %c0_3] : memref<2x256xf32, #tpu.memory_space<vmem>>, vector<1x256xf32>
    %8 = vector.broadcast %6 : vector<8x1xf32> to vector<8x256xf32>
    %9 = vector.broadcast %7 : vector<1x256xf32> to vector<8x256xf32>
    %10 = arith.mulf %8, %9 : vector<8x256xf32>
    %11 = arith.addf %5, %10 : vector<8x256xf32>
    %c0_4 = arith.constant 0 : index
    %c0_5 = arith.constant 0 : index
    %12 = vector.load %arg2[%c0_4, %c0_5] : memref<1x256xf32, #tpu.memory_space<vmem>>, vector<1x256xf32>
    %13 = vector.broadcast %12 : vector<1x256xf32> to vector<8x256xf32>
    %14 = arith.addf %11, %13 : vector<8x256xf32>
    %cst = arith.constant 0.000000e+00 : f32
    %15 = vector.broadcast %cst : f32 to vector<8x256xf32>
    %16 = arith.maximumf %14, %15 : vector<8x256xf32>
    %17 = arith.truncf %16 : vector<8x256xf32> to vector<8x256xbf16>
    %c0_6 = arith.constant 0 : index
    %c0_7 = arith.constant 0 : index
    %18 = vector.load %arg3[%c0_6, %c0_7] : memref<256x256xbf16, #tpu.memory_space<vmem>>, vector<256x256xbf16>
    %cst_8 = arith.constant dense<0.000000e+00> : vector<8x256xf32>
    %19 = tpu.matmul %17, %18, %cst_8 {dimension_numbers = #tpu.dot_dimension_numbers<[1], [0], [0], [1], [0, 0, 1, 1], [], []>} : vector<8x256xbf16>, vector<256x256xbf16>, vector<8x256xf32> -> vector<8x256xf32>
    %c0_9 = arith.constant 0 : index
    %c0_10 = arith.constant 0 : index
    %20 = vector.load %arg4[%c0_9, %c0_10] : memref<1x256xf32, #tpu.memory_space<vmem>>, vector<1x256xf32>
    %21 = vector.broadcast %20 : vector<1x256xf32> to vector<8x256xf32>
    %22 = arith.addf %19, %21 : vector<8x256xf32>
    %cst_11 = arith.constant 0.000000e+00 : f32
    %23 = vector.broadcast %cst_11 : f32 to vector<8x256xf32>
    %24 = arith.maximumf %22, %23 : vector<8x256xf32>
    %25 = arith.truncf %24 : vector<8x256xf32> to vector<8x256xbf16>
    %c0_12 = arith.constant 0 : index
    %c0_13 = arith.constant 0 : index
    %26 = vector.load %arg5[%c0_12, %c0_13] : memref<256x512xbf16, #tpu.memory_space<vmem>>, vector<256x512xbf16>
    %cst_14 = arith.constant dense<0.000000e+00> : vector<8x512xf32>
    %27 = tpu.matmul %25, %26, %cst_14 {dimension_numbers = #tpu.dot_dimension_numbers<[1], [0], [0], [1], [0, 0, 1, 1], [], []>} : vector<8x256xbf16>, vector<256x512xbf16>, vector<8x512xf32> -> vector<8x512xf32>
    %c0_15 = arith.constant 0 : index
    %c0_16 = arith.constant 0 : index
    %28 = vector.load %arg6[%c0_15, %c0_16] : memref<1x512xf32, #tpu.memory_space<vmem>>, vector<1x512xf32>
    %29 = vector.broadcast %28 : vector<1x512xf32> to vector<8x512xf32>
    %30 = arith.addf %27, %29 : vector<8x512xf32>
    %cst_17 = arith.constant 0.000000e+00 : f32
    %31 = vector.broadcast %cst_17 : f32 to vector<8x512xf32>
    %32 = arith.maximumf %30, %31 : vector<8x512xf32>
    %c0_18 = arith.constant 0 : index
    %c0_19 = arith.constant 0 : index
    %33 = vector.load %arg7[%c0_18, %c0_19] : memref<1x512xf32, #tpu.memory_space<vmem>>, vector<1x512xf32>
    %34 = vector.broadcast %33 : vector<1x512xf32> to vector<8x512xf32>
    %35 = arith.mulf %32, %34 : vector<8x512xf32>
    %36 = vector.extract_strided_slice %35 {offsets = [0, 0], sizes = [8, 256], strides = [1, 1]} : vector<8x512xf32> to vector<8x256xf32>
    %cst_20 = arith.constant dense<0.000000e+00> : vector<8xf32>
    %37 = vector.multi_reduction <add>, %36, %cst_20 [1] : vector<8x256xf32> to vector<8xf32>
    %38 = vector.shape_cast %37 : vector<8xf32> to vector<8x1xf32>
    %c0_21 = arith.constant 0 : index
    %c0_22 = arith.constant 0 : index
    %39 = vector.load %arg8[%c0_21, %c0_22] : memref<1x1xf32, #tpu.memory_space<vmem>>, vector<1x1xf32>
    %40 = vector.broadcast %39 : vector<1x1xf32> to vector<8x1xf32>
    %41 = arith.addf %38, %40 : vector<8x1xf32>
    %42 = vector.extract_strided_slice %35 {offsets = [0, 256], sizes = [8, 256], strides = [1, 1]} : vector<8x512xf32> to vector<8x256xf32>
    %cst_23 = arith.constant dense<0.000000e+00> : vector<8xf32>
    %43 = vector.multi_reduction <add>, %42, %cst_23 [1] : vector<8x256xf32> to vector<8xf32>
    %44 = vector.shape_cast %43 : vector<8xf32> to vector<8x1xf32>
    %c0_24 = arith.constant 0 : index
    %c0_25 = arith.constant 0 : index
    %45 = vector.load %arg9[%c0_24, %c0_25] : memref<1x1xf32, #tpu.memory_space<vmem>>, vector<1x1xf32>
    %46 = vector.broadcast %45 : vector<1x1xf32> to vector<8x1xf32>
    %47 = arith.addf %44, %46 : vector<8x1xf32>
    %48 = vector.shape_cast %47 : vector<8x1xf32> to vector<1x8x1xf32>
    %cst_26 = arith.constant dense<0.000000e+00> : vector<1xf32>
    %49 = vector.multi_reduction <add>, %48, %cst_26 [1, 2] : vector<1x8x1xf32> to vector<1xf32>
    %50 = vector.shape_cast %49 : vector<1xf32> to vector<1x1x1xf32>
    %51 = vector.extract %50[0, 0, 0] : f32 from vector<1x1x1xf32>
    %cst_27 = arith.constant 8.000000e+00 : f32
    %52 = arith.divf %51, %cst_27 : f32
    %53 = vector.broadcast %52 : f32 to vector<8x1xf32>
    %54 = arith.subf %47, %53 : vector<8x1xf32>
    %55 = arith.addf %41, %54 : vector<8x1xf32>
    %56 = vector.shape_cast %55 : vector<8x1xf32> to vector<8x1xf32>
    %57 = vector.broadcast %56 : vector<8x1xf32> to vector<8x128xf32>
    %c0_28 = arith.constant 0 : index
    %c0_29 = arith.constant 0 : index
    %58 = vector.load %arg10[%c0_28, %c0_29] : memref<8x128xf32, #tpu.memory_space<vmem>>, vector<8x128xf32>
    tpu.vector_store %arg10[%c0_28, %c0_29], %57 {strides = array<i32>} : memref<8x128xf32, #tpu.memory_space<vmem>>, vector<8x128xf32>,
    return
  }
}

</mosaic_0001>

<bundles_post_ra>
// kernel: tpu_custom_call.1
= control target key start
LH: loop header
LB: loop body
LE: loop exit
PB: predicated region body
PF: predicated region fallthrough
CT: control target
= control target key end

     0   :  { %s1400_s0 = inlined_call_operand.vmem [shape: f32[8,2], index: 0, kind: input, shape index: {}]   ;;  %s1401_s1 = inlined_call_operand.vmem [shape: f32[2,256], index: 1, kind: input, shape index: {}]   ;;  %s1402_s2 = inlined_call_operand.vmem [shape: f32[1,256], index: 2, kind: input, shape index: {}]   ;;  %s1403_s3 = inlined_call_operand.hbm [shape: bf16[256,256], index: 3, kind: input, shape index: {}]   ;;  %s1404_s4 = inlined_call_operand.vmem [shape: f32[1,256], index: 4, kind: input, shape index: {}]   ;;  %s1405_s5 = inlined_call_operand.hbm [shape: bf16[256,512], index: 5, kind: input, shape index: {}]   ;;  %s1406_s6 = inlined_call_operand.vmem [shape: f32[1,512], index: 6, kind: input, shape index: {}]   ;;  %s1407_s7 = inlined_call_operand.vmem [shape: f32[1,512], index: 7, kind: input, shape index: {}]   ;;  %s1408_s8 = inlined_call_operand.<no memory space> [shape: f32[1,1], index: 8, kind: input, shape index: {}]   ;;  %s1409_s10 = inlined_call_operand.hbm [shape: f32[8,128], index: 10, kind: output, shape index: {}]   ;;  %s1410_s9 = inlined_call_operand.<no memory space> [shape: f32[1,1], index: 9, kind: input, shape index: {}]  }
   0x1   :  { %v15_v0 = vstv %s1408_s8  ;;  %v17_v1 = vstv %s1410_s9 }
   0x2   :  { %16 = vst [vmem:[#allocation2] sm:$0x1] %v15_v0  ;;  %18 = vst [vmem:[#allocation3] sm:$0x1] %v17_v1 }
   0x3   :  { %19 = vsyncpa [#allocation5], 0 }
   0x4   :  { %20 = vsyncpa [#allocation8], 0 }
   0x5   :  { %21 = vsyncpa [#allocation6], 0  ;;  %s1278_s17 = smov [#allocation4]  }
   0x6   :  { %s33_s18 = sshll.u32 %s1278_s17, 4  ;;  %s34_s18 = int_to_ptr.vmem [resolvable:$true] %s33_s18 }
   0x7   :  { %s1220_s19 = scalar_lea.vmem %s34_s18, 4096  ;;  %p1225_p1 = scmp.lt.s32.totalorder %s34_s18, %s34_s18 }
   0x8   :  { %p1221_p0 = scmp.ne.s32.totalorder %s34_s18, %s1220_s19  ;;  %p1226_p2 = scmp.lt.s32.totalorder %s1220_s19, %s1220_s19 }
   0xa   :  { %p1227_p3 = por %p1226_p2, %p1225_p1 }
   0xc   :  { %p1228_p4 = pnand %p1227_p3, %p1221_p0 }
   0xe   :  { %1231 = shalt.err (!%p1228_p4)
}
   0xf   :  { %s1279_s8 = smov 128   ;;  %s1280_s20 = smov 8  }
  0x10   :  { %39 = dma.hbm_to_vmem [thread:$0]  %s1403_s3, 4096, %s34_s18, [#allocation5], %s1279_s8, %s1279_s8, %s1280_s20  }
  0x11   :  { %s1281_s9 = smov [#allocation7]  }
  0x12   :  { %s47_s23 = sshll.u32 %s1281_s9, 4  ;;  %s48_s23 = int_to_ptr.vmem [resolvable:$true] %s47_s23 }
  0x13   :  { %s1240_s24 = scalar_lea.vmem %s48_s23, 8192  ;;  %p1245_p6 = scmp.lt.s32.totalorder %s48_s23, %s48_s23 }
  0x14   :  { %p1241_p5 = scmp.ne.s32.totalorder %s48_s23, %s1240_s24  ;;  %p1246_p7 = scmp.lt.s32.totalorder %s1240_s24, %s1240_s24 }
  0x16   :  { %p1247_p8 = por %p1246_p7, %p1245_p6 }
  0x18   :  { %p1248_p9 = pnand %p1247_p8, %p1241_p5 }
  0x1a   :  { %1251 = shalt.err (!%p1248_p9)
}
  0x1b   :  { %s1282_s25 = smov 256   ;;  %s1283_s26 = smov 16  }
  0x1c   :  { %53 = dma.hbm_to_vmem [thread:$0]  %s1405_s5, 8192, %s48_s23, [#allocation8], %s1282_s25, %s1282_s25, %s1283_s26  }
  0x1d   :  { %1272 = dma.done.wait [#allocation5], 4096  }
  0x1e   :  { %1273 = vsyncadd [#allocation5], 4294963200 }
  0x1f   :  { %1274 = dma.done.wait [#allocation8], 8192  }
  0x20   :  { %1275 = vsyncadd [#allocation8], 4294959104  ;;  %v1284_v2 = vmov 0   ;;  %v68_v3 = vld [vmem:[%s1400_s0] sm:$0xff]  ;;  %v1070_v5 = vld [vmem:[#allocation4 + $0x70] ss:$8 sps:$4 sm:$0xff]  }
  0x21   :  { %1065 = vset.pattern.permute.xlu0 %v1284_v2  ;;  %v1068_v4 = vld [vmem:[#allocation4 + $0x74] ss:$8 sps:$4 sm:$0xff]   ;;  %v1071_v6 = vld [vmem:[#allocation4 + $0x64] ss:$8 sps:$4 sm:$0xff]   ;;  %v1073_v7 = vld [vmem:[#allocation4 + $0x60] ss:$8 sps:$4 sm:$0xff]  }
  0x22   :  { %72 = vperm.xlu0 %1065, %v68_v3   ;;  %331 = vmatprep.subr.bf16.mxu0 %v1068_v4  ;;  %v1285_v8 = vmov 1   ;;  %v1074_v9 = vld [vmem:[#allocation4 + $0x54] ss:$8 sps:$4 sm:$0xff]   ;;  %v1076_v10 = vld [vmem:[#allocation4 + $0x50] ss:$8 sps:$4 sm:$0xff]   ;;  %vm916_vm0 = vcmask 7168  }
  0x23   :  { %332 = vmatpush1.bf16.msra.mxu0 %v1070_v5  ;;  %v1077_v11 = vld [vmem:[#allocation4 + $0x44] ss:$8 sps:$4 sm:$0xff]   ;;  %v1079_v12 = vld [vmem:[#allocation4 + $0x40] ss:$8 sps:$4 sm:$0xff]   ;;  %v1080_v13 = vld [vmem:[#allocation4 + $0x34] ss:$8 sps:$4 sm:$0xff]  }
  0x24   :  { %333 = vmatprep.subr.bf16.mxu0 %v1071_v6  ;;  %v1082_v14 = vld [vmem:[#allocation4 + $0x30] ss:$8 sps:$4 sm:$0xff]   ;;  %v1083_v15 = vld [vmem:[#allocation4 + $0x24] ss:$8 sps:$4 sm:$0xff]   ;;  %v1085_v16 = vld [vmem:[#allocation4 + $0x20] ss:$8 sps:$4 sm:$0xff]  }
  0x25   :  { %v1086_v17 = vld [vmem:[#allocation4 + $0x14] ss:$8 sps:$4 sm:$0xff]   ;;  %v1088_v19 = vld [vmem:[#allocation4 + $0x10] ss:$8 sps:$4 sm:$0xff]   ;;  %v1089_v20 = vld [vmem:[#allocation4 + $0x4] ss:$8 sps:$4 sm:$0xff]  }
  0x26   :  { %1066 = vset.pattern.permute.xlu0 %v1285_v8  ;;  %v1116_v18 = vld [vmem:[#allocation7 + $0xe4] ss:$16 sps:$4 sm:$0xff]   ;;  %v1121_v21 = vld [vmem:[#allocation7 + $0xe0] ss:$16 sps:$4 sm:$0xff]   ;;  %v1120_v58 = vld [vmem:[#allocation7 + $0xec] ss:$16 sps:$4 sm:$0xff]  }
  0x27   :  { %91 = vperm.xlu0 %1066, %v68_v3   ;;  %334 = vmatpush1.bf16.msra.mxu0 %v1073_v7  ;;  %v1122_v22 = vld [vmem:[#allocation7 + $0xc4] ss:$16 sps:$4 sm:$0xff]   ;;  %v1091_v23 = vld [vmem:[#allocation4] ss:$8 sps:$4 sm:$0xff]   ;;  %v1094_v28 = vld [vmem:[#allocation4 + $0xf0] ss:$8 sps:$4 sm:$0xff]  }
  0x28   :  { %335 = vmatprep.subr.bf16.mxu0 %v1074_v9  ;;  %782 = vmatprep.subr.bf16.mxu1 %v1116_v18  ;;  %v1127_v24 = vld [vmem:[#allocation7 + $0xc0] ss:$16 sps:$4 sm:$0xff]   ;;  %v1128_v25 = vld [vmem:[#allocation7 + $0xa4] ss:$16 sps:$4 sm:$0xff]   ;;  %s1286_s17 = smov [#allocation9]  }
  0x29   :  { %783 = vmatpush1.bf16.msra.mxu1 %v1121_v21  ;;  %v1092_v26 = vld [vmem:[#allocation4 + $0xf4] ss:$8 sps:$4 sm:$0xff]   ;;  %v1133_v27 = vld [vmem:[#allocation7 + $0xa0] ss:$16 sps:$4 sm:$0xff]   ;;  %v1095_v30 = vld [vmem:[#allocation4 + $0xe4] ss:$8 sps:$4 sm:$0xff]  }
  0x2a   :  { %784 = vmatprep.subr.bf16.mxu1 %v1122_v22  ;;  %v1134_v29 = vld [vmem:[#allocation7 + $0x84] ss:$16 sps:$4 sm:$0xff]   ;;  %v1097_v31 = vld [vmem:[#allocation4 + $0xe0] ss:$8 sps:$4 sm:$0xff]   ;;  %v1100_v36 = vld [vmem:[#allocation4 + $0xd0] ss:$8 sps:$4 sm:$0xff]  }
  0x2b   :  { %1067 = vset.pattern.permute.xlu0 %v1284_v2  ;;  %336 = vmatpush1.bf16.msra.mxu0 %v1076_v10  ;;  %v1139_v32 = vld [vmem:[#allocation7 + $0x80] ss:$16 sps:$4 sm:$0xff]   ;;  %v1140_v33 = vld [vmem:[#allocation7 + $0x64] ss:$16 sps:$4 sm:$0xff]   ;;  %v76_v2 = vlaneseq  ;;  %s945_s18 = sshll.u32 %s1286_s17, 4  ;;  %s946_s18 = int_to_ptr.vmem [resolvable:$true] %s945_s18 }
  0x2c   :  { %337 = vmatprep.subr.bf16.mxu0 %v1077_v11  ;;  %v1098_v34 = vld [vmem:[#allocation4 + $0xd4] ss:$8 sps:$4 sm:$0xff]   ;;  %v1145_v35 = vld [vmem:[#allocation7 + $0x60] ss:$16 sps:$4 sm:$0xff]   ;;  %v1101_v38 = vld [vmem:[#allocation4 + $0xc4] ss:$8 sps:$4 sm:$0xff]   ;;  %p1257_p11 = scmp.lt.s32.totalorder %s946_s18, %s946_s18 }
  0x2d   :  { %785 = vmatpush1.bf16.msra.mxu1 %v1127_v24  ;;  %v1146_v37 = vld [vmem:[#allocation7 + $0x44] ss:$16 sps:$4 sm:$0xff]   ;;  %v1103_v39 = vld [vmem:[#allocation4 + $0xc0] ss:$8 sps:$4 sm:$0xff]   ;;  %v1106_v44 = vld [vmem:[#allocation4 + $0xb0] ss:$8 sps:$4 sm:$0xff]  }
  0x2e   :  { %786 = vmatprep.subr.bf16.mxu1 %v1128_v25  ;;  %v1151_v40 = vld [vmem:[#allocation7 + $0x40] ss:$16 sps:$4 sm:$0xff]   ;;  %v1152_v41 = vld [vmem:[#allocation7 + $0x24] ss:$16 sps:$4 sm:$0xff]   ;;  %v1357_v3 = vshrl.u32 %v76_v2, 7  ;;  %s1252_s19 = scalar_lea.vmem %s946_s18, 128 }
  0x2f   :  { %338 = vmatpush1.bf16.msra.mxu0 %v1079_v12  ;;  %v1104_v42 = vld [vmem:[#allocation4 + $0xb4] ss:$8 sps:$4 sm:$0xff]   ;;  %v1157_v43 = vld [vmem:[#allocation7 + $0x20] ss:$16 sps:$4 sm:$0xff]   ;;  %v1107_v46 = vld [vmem:[#allocation4 + $0xa4] ss:$8 sps:$4 sm:$0xff]   ;;  %p1253_p10 = scmp.ne.s32.totalorder %s946_s18, %s1252_s19  ;;  %p1258_p12 = scmp.lt.s32.totalorder %s1252_s19, %s1252_s19 }
  0x30   :  { %339 = vmatprep.subr.bf16.mxu0 %v1080_v13  ;;  %v1158_v45 = vld [vmem:[#allocation7 + $0x4] ss:$16 sps:$4 sm:$0xff]   ;;  %v1109_v47 = vld [vmem:[#allocation4 + $0xa0] ss:$8 sps:$4 sm:$0xff]   ;;  %v1112_v51 = vld [vmem:[#allocation4 + $0x90] ss:$8 sps:$4 sm:$0xff]  }
  0x31   :  { %787 = vmatpush1.bf16.msra.mxu1 %v1133_v27  ;;  %v1110_v48 = vld [vmem:[#allocation4 + $0x94] ss:$8 sps:$4 sm:$0xff]   ;;  %v1163_v49 = vld [vmem:[#allocation7] ss:$16 sps:$4 sm:$0xff]   ;;  %v1113_v53 = vld [vmem:[#allocation4 + $0x84] ss:$8 sps:$4 sm:$0xff]   ;;  %p1259_p13 = por %p1258_p12, %p1257_p11 }
  0x32   :  { %788 = vmatprep.subr.bf16.mxu1 %v1134_v29  ;;  %v1164_v50 = vld [vmem:[#allocation7 + $0x1e4] ss:$16 sps:$4 sm:$0xff]   ;;  %v1169_v52 = vld [vmem:[#allocation7 + $0x1e0] ss:$16 sps:$4 sm:$0xff]   ;;  %v1360_v4 = vsub.s32 0, %v1357_v3  ;;  %v1363_v5 = vsub.s32 1, %v1357_v3 }
  0x33   :  { %340 = vmatpush1.bf16.msra.mxu0 %v1082_v14  ;;  %v1170_v54 = vld [vmem:[#allocation7 + $0x1c4] ss:$16 sps:$4 sm:$0xff]   ;;  %v1115_v55 = vld [vmem:[#allocation4 + $0x80] ss:$8 sps:$4 sm:$0xff]   ;;  %v109_v13 = vld [vmem:[%s1402_s2] sm:$0x3]  ;;  %p1260_p0 = pnand %p1259_p13, %p1253_p10 }
  0x34   :  { %341 = vmatprep.subr.bf16.mxu0 %v1083_v15  ;;  %v1175_v56 = vld [vmem:[#allocation7 + $0x1c0] ss:$16 sps:$4 sm:$0xff]   ;;  %v1176_v57 = vld [vmem:[#allocation7 + $0x1a4] ss:$16 sps:$4 sm:$0xff]   ;;  %v114_v15 = vrot.slane %v109_v13, %v1360_v4  ;;  %v1118_v29 = vld [vmem:[#allocation7 + $0xe8] ss:$16 sps:$4 sm:$0xff]  }
  0x35   :  { %789 = vmatpush1.bf16.msra.mxu1 %v1139_v32  ;;  %v1181_v59 = vld [vmem:[#allocation7 + $0x1a0] ss:$16 sps:$4 sm:$0xff]   ;;  %v1182_v60 = vld [vmem:[#allocation7 + $0x184] ss:$16 sps:$4 sm:$0xff]   ;;  %v1132_v32 = vld [vmem:[#allocation7 + $0xac] ss:$16 sps:$4 sm:$0xff]  }
  0x36   :  { %790 = vmatprep.subr.bf16.mxu1 %v1140_v33  ;;  %v1187_v61 = vld [vmem:[#allocation7 + $0x180] ss:$16 sps:$4 sm:$0xff]   ;;  %v1188_v62 = vld [vmem:[#allocation7 + $0x164] ss:$16 sps:$4 sm:$0xff]   ;;  %v1130_v33 = vld [vmem:[#allocation7 + $0xa8] ss:$16 sps:$4 sm:$0xff]  }
  0x37   :  { %342 = vmatpush1.bf16.msra.mxu0 %v1085_v16  ;;  %v1193_v63 = vld [vmem:[#allocation7 + $0x160] ss:$16 sps:$4 sm:$0xff]   ;;  %v1194_v0 = vld [vmem:[#allocation7 + $0x144] ss:$16 sps:$4 sm:$0xff]   ;;  %v118_v16 = vrot.slane %v109_v13, %v1363_v5 }
  0x38   :  { %343 = vmatprep.subr.bf16.mxu0 %v1086_v17  ;;  %v1199_v1 = vld [vmem:[#allocation7 + $0x140] ss:$16 sps:$4 sm:$0xff]  }
  0x39   :  { %791 = vmatpush1.bf16.msra.mxu1 %v1145_v35  ;;  %v69_v6 = vld [vmem:[%s1401_s1] ss:$2 sm:$0x3]  ;;  %v955_v7 = vld [vmem:[%s1401_s1 + $0x1] ss:$2 sm:$0x3] }
  0x3a   :  { %792 = vmatprep.subr.bf16.mxu1 %v1146_v37  ;;  %v79_v9 = vrot.slane %v69_v6, %v1360_v4  ;;  %v83_v10 = vrot.slane %v69_v6, %v1363_v5  ;;  %v98_v11 = vrot.slane %v955_v7, %v1360_v4  ;;  %v102_v12 = vrot.slane %v955_v7, %v1363_v5  ;;  %v1136_v35 = vld [vmem:[#allocation7 + $0x88] ss:$16 sps:$4 sm:$0xff]  }
  0x3b   :  { %344 = vmatpush1.bf16.msra.mxu0 %v1088_v19  ;;  %v1142_v37 = vld [vmem:[#allocation7 + $0x68] ss:$16 sps:$4 sm:$0xff]  }
  0x3c   :  { %345 = vmatprep.subr.bf16.mxu0 %v1089_v20 }
  0x3d   :  { %793 = vmatpush1.bf16.msra.mxu1 %v1151_v40  ;;  %v1156_v40 = vld [vmem:[#allocation7 + $0x2c] ss:$16 sps:$4 sm:$0xff]  }
  0x3e   :  { %794 = vmatprep.subr.bf16.mxu1 %v1152_v41  ;;  %v1154_v41 = vld [vmem:[#allocation7 + $0x28] ss:$16 sps:$4 sm:$0xff]  }
  0x3f   :  { %346 = vmatpush1.bf16.msra.mxu0 %v1091_v23 }
  0x40   :  { %347 = vmatprep.subr.bf16.mxu0 %v1092_v26 }
  0x41   :  { %795 = vmatpush1.bf16.msra.mxu1 %v1157_v43  ;;  %v1160_v43 = vld [vmem:[#allocation7 + $0x8] ss:$16 sps:$4 sm:$0xff]  }
  0x42   :  { %796 = vmatprep.subr.bf16.mxu1 %v1158_v45  ;;  %v1166_v45 = vld [vmem:[#allocation7 + $0x1e8] ss:$16 sps:$4 sm:$0xff]  }
  0x43   :  { %348 = vmatpush2.bf16.msra.mxu0 %v1094_v28 }
  0x44   :  { %349 = vmatprep.subr.bf16.mxu0 %v1095_v30  ;;  %v1126_v30 = vld [vmem:[#allocation7 + $0xcc] ss:$16 sps:$4 sm:$0xff]  }
  0x45   :  { %797 = vmatpush1.bf16.msra.mxu1 %v1163_v49  ;;  %v1178_v49 = vld [vmem:[#allocation7 + $0x1a8] ss:$16 sps:$4 sm:$0xff]  }
  0x46   :  { %798 = vmatprep.subr.bf16.mxu1 %v1164_v50  ;;  %v1186_v50 = vld [vmem:[#allocation7 + $0x18c] ss:$16 sps:$4 sm:$0xff]  }
  0x47   :  { %350 = vmatpush2.bf16.msra.mxu0 %v1097_v31  ;;  %v1124_v31 = vld [vmem:[#allocation7 + $0xc8] ss:$16 sps:$4 sm:$0xff]  }
  0x48   :  { %351 = vmatprep.subr.bf16.mxu0 %v1098_v34  ;;  %v1138_v34 = vld [vmem:[#allocation7 + $0x8c] ss:$16 sps:$4 sm:$0xff]  }
  0x49   :  { %799 = vmatpush2.bf16.msra.mxu1 %v1169_v52  ;;  %v1192_v52 = vld [vmem:[#allocation7 + $0x16c] ss:$16 sps:$4 sm:$0xff]  }
  0x4a   :  { %800 = vmatprep.subr.bf16.mxu1 %v1170_v54  ;;  %v1198_v54 = vld [vmem:[#allocation7 + $0x14c] ss:$16 sps:$4 sm:$0xff]  }
  0x4b   :  { %352 = vmatpush2.bf16.msra.mxu0 %v1100_v36  ;;  %v1144_v36 = vld [vmem:[#allocation7 + $0x6c] ss:$16 sps:$4 sm:$0xff]  }
  0x4c   :  { %353 = vmatprep.subr.bf16.mxu0 %v1101_v38  ;;  %v1150_v38 = vld [vmem:[#allocation7 + $0x4c] ss:$16 sps:$4 sm:$0xff]  }
  0x4d   :  { %801 = vmatpush2.bf16.msra.mxu1 %v1175_v56  ;;  %v1200_v56 = vld [vmem:[#allocation7 + $0x124] ss:$16 sps:$4 sm:$0xff]  }
  0x4e   :  { %802 = vmatprep.subr.bf16.mxu1 %v1176_v57  ;;  %v1204_v57 = vld [vmem:[#allocation7 + $0x12c] ss:$16 sps:$4 sm:$0xff]  }
  0x4f   :  { %354 = vmatpush2.bf16.msra.mxu0 %v1103_v39  ;;  %v1148_v39 = vld [vmem:[#allocation7 + $0x48] ss:$16 sps:$4 sm:$0xff]  }
  0x50   :  { %355 = vmatprep.subr.bf16.mxu0 %v1104_v42  ;;  %v1162_v42 = vld [vmem:[#allocation7 + $0xc] ss:$16 sps:$4 sm:$0xff]  }
  0x51   :  { %803 = vmatpush2.bf16.msra.mxu1 %v1181_v59  ;;  %v1205_v59 = vld [vmem:[#allocation7 + $0x120] ss:$16 sps:$4 sm:$0xff]  }
  0x52   :  { %804 = vmatprep.subr.bf16.mxu1 %v1182_v60  ;;  %v1206_v60 = vld [vmem:[#allocation7 + $0x104] ss:$16 sps:$4 sm:$0xff]  }
  0x53   :  { %356 = vmatpush2.bf16.msra.mxu0 %v1106_v44  ;;  %v1168_v44 = vld [vmem:[#allocation7 + $0x1ec] ss:$16 sps:$4 sm:$0xff]  }
  0x54   :  { %357 = vmatprep.subr.bf16.mxu0 %v1107_v46  ;;  %v1174_v46 = vld [vmem:[#allocation7 + $0x1cc] ss:$16 sps:$4 sm:$0xff]  }
  0x55   :  { %805 = vmatpush2.bf16.msra.mxu1 %v1187_v61  ;;  %v1210_v61 = vld [vmem:[#allocation7 + $0x10c] ss:$16 sps:$4 sm:$0xff]  }
  0x56   :  { %806 = vmatprep.subr.bf16.mxu1 %v1188_v62  ;;  %v1208_v62 = vld [vmem:[#allocation7 + $0x108] ss:$16 sps:$4 sm:$0xff]  }
  0x57   :  { %358 = vmatpush2.bf16.msra.mxu0 %v1109_v47  ;;  %v1172_v47 = vld [vmem:[#allocation7 + $0x1c8] ss:$16 sps:$4 sm:$0xff]  }
  0x58   :  { %359 = vmatprep.subr.bf16.mxu0 %v1110_v48  ;;  %v1180_v48 = vld [vmem:[#allocation7 + $0x1ac] ss:$16 sps:$4 sm:$0xff]  }
  0x59   :  { %807 = vmatpush2.bf16.msra.mxu1 %v1193_v63  ;;  %v1211_v63 = vld [vmem:[#allocation7 + $0x100] ss:$16 sps:$4 sm:$0xff]  }
  0x5a   :  { %808 = vmatprep.subr.bf16.mxu1 %v1194_v0  ;;  %v159_v0 = vld [vmem:[%s1404_s4] sm:$0x3] }
  0x5b   :  { %360 = vmatpush2.bf16.msra.mxu0 %v1112_v51  ;;  %v1184_v51 = vld [vmem:[#allocation7 + $0x188] ss:$16 sps:$4 sm:$0xff]   ;;  %v168_v2 = vrot.slane %v159_v0, %v1363_v5 }
  0x5c   :  { %361 = vmatprep.subr.bf16.mxu0 %v1113_v53  ;;  %v1190_v53 = vld [vmem:[#allocation7 + $0x168] ss:$16 sps:$4 sm:$0xff]  }
  0x5d   :  { %809 = vmatpush2.bf16.msra.mxu1 %v1199_v1  ;;  %v164_v1 = vrot.slane %v159_v0, %v1360_v4 }
  0x5e   :  { %810 = vmatprep.subr.bf16.mxu1 %v1200_v56 }
  0x5f   :  { %362 = vmatpush2.bf16.msra.mxu0 %v1115_v55  ;;  %v1196_v55 = vld [vmem:[#allocation7 + $0x148] ss:$16 sps:$4 sm:$0xff]  }
  0x60   :  { %823 = vmatprep.subr.bf16.mxu0 %v1120_v58  ;;  %v1202_v58 = vld [vmem:[#allocation7 + $0x128] ss:$16 sps:$4 sm:$0xff]  }
  0x61   :  { %811 = vmatpush2.bf16.msra.mxu1 %v1205_v59 }
  0x62   :  { %812 = vmatprep.subr.bf16.mxu1 %v1206_v60 }
  0x65   :  { %813 = vmatpush2.bf16.msra.mxu1 %v1211_v63 }
  0x9d   :  { %v73_v8 = vpop.permute.xlu0 %72 }
  0x9e   :  { %v86_v17 = vmul.f32 %v79_v9, %v73_v8  ;;  %v87_v18 = vmul.f32 %v83_v10, %v73_v8 }
  0xa2   :  { %v92_v14 = vpop.permute.xlu0 %91 }
  0xa3   :  { %v105_v19 = vmul.f32 %v98_v11, %v92_v14  ;;  %v106_v20 = vmul.f32 %v102_v12, %v92_v14 }
  0xa5   :  { %v107_v21 = vadd.f32 %v105_v19, %v86_v17  ;;  %v108_v22 = vadd.f32 %v106_v20, %v87_v18  ;;  %v440_v17 = vld [vmem:[%s1406_s6] sm:$0xf]  ;;  %v456_v18 = vsub.s32 3, %v1357_v3 }
  0xa6   :  { %v445_v19 = vrot.slane %v440_v17, %v1360_v4 }
  0xa7   :  { %v122_v23 = vadd.f32 %v118_v16, %v108_v22  ;;  %v121_v24 = vadd.f32 %v114_v15, %v107_v21  ;;  %v452_v16 = vsub.s32 2, %v1357_v3  ;;  %v868_v21 = vld [vmem:[%s1407_s7] sm:$0xf]  ;;  %v449_v22 = vrot.slane %v440_v17, %v1363_v5 }
  0xa9   :  { %v124_v25 = vmax.f32 %v122_v23, 0.0  ;;  %v123_v26 = vmax.f32 %v121_v24, 0.0  ;;  %v453_v20 = vrot.slane %v440_v17, %v452_v16  ;;  %v457_v23 = vrot.slane %v440_v17, %v456_v18 }
  0xab   :  { %v126_v27 = vpack.c.bf16 %v124_v25, %v124_v25  ;;  %v125_v28 = vpack.c.bf16 %v123_v26, %v123_v26 }
  0xad   :  { %363 = vmatprep.mubr.bf16.mxu0 %v126_v27  ;;  %v873_v27 = vrot.slane %v868_v21, %v1360_v4 }
  0xae   :  { %364 = vmatmul.mubr.bf16.vlgmr.msra.gmra.mxu0 %v125_v28 }
  0xaf   :  { %824 = vmatpush1.bf16.msra.mxu0 %v1118_v29 }
  0xb0   :  { %825 = vmatprep.subr.bf16.mxu0 %v1126_v30  ;;  %v877_v30 = vrot.slane %v868_v21, %v1363_v5  ;;  %v1053_v5 = vld [vmem:[#allocation3] ss:$0 sm:$0xff] }
  0xb3   :  { %826 = vmatpush1.bf16.msra.mxu0 %v1124_v31  ;;  %v881_v31 = vrot.slane %v868_v21, %v452_v16 }
  0xb4   :  { %827 = vmatprep.subr.bf16.mxu0 %v1132_v32  ;;  %v885_v32 = vrot.slane %v868_v21, %v456_v18 }
  0xb7   :  { %828 = vmatpush1.bf16.msra.mxu0 %v1130_v33 }
  0xb8   :  { %829 = vmatprep.subr.bf16.mxu0 %v1138_v34 }
  0xbb   :  { %830 = vmatpush1.bf16.msra.mxu0 %v1136_v35 }
  0xbc   :  { %831 = vmatprep.subr.bf16.mxu0 %v1144_v36 }
  0xbf   :  { %832 = vmatpush1.bf16.msra.mxu0 %v1142_v37 }
  0xc0   :  { %833 = vmatprep.subr.bf16.mxu0 %v1150_v38 }
  0xc3   :  { %834 = vmatpush1.bf16.msra.mxu0 %v1148_v39 }
  0xc4   :  { %835 = vmatprep.subr.bf16.mxu0 %v1156_v40 }
  0xc7   :  { %836 = vmatpush1.bf16.msra.mxu0 %v1154_v41 }
  0xc8   :  { %837 = vmatprep.subr.bf16.mxu0 %v1162_v42 }
  0xcb   :  { %838 = vmatpush1.bf16.msra.mxu0 %v1160_v43 }
  0xcc   :  { %839 = vmatprep.subr.bf16.mxu0 %v1168_v44 }
  0xcf   :  { %840 = vmatpush2.bf16.msra.mxu0 %v1166_v45 }
  0xd0   :  { %841 = vmatprep.subr.bf16.mxu0 %v1174_v46 }
  0xd3   :  { %842 = vmatpush2.bf16.msra.mxu0 %v1172_v47 }
  0xd4   :  { %843 = vmatprep.subr.bf16.mxu0 %v1180_v48 }
  0xd7   :  { %844 = vmatpush2.bf16.msra.mxu0 %v1178_v49 }
  0xd8   :  { %845 = vmatprep.subr.bf16.mxu0 %v1186_v50 }
  0xdb   :  { %846 = vmatpush2.bf16.msra.mxu0 %v1184_v51 }
  0xdc   :  { %847 = vmatprep.subr.bf16.mxu0 %v1192_v52 }
  0xdf   :  { %848 = vmatpush2.bf16.msra.mxu0 %v1190_v53 }
  0xe0   :  { %849 = vmatprep.subr.bf16.mxu0 %v1198_v54 }
  0xe3   :  { %850 = vmatpush2.bf16.msra.mxu0 %v1196_v55 }
  0xe4   :  { %851 = vmatprep.subr.bf16.mxu0 %v1204_v57 }
  0xe7   :  { %852 = vmatpush2.bf16.msra.mxu0 %v1202_v58  ;;  %v1052_v58 = vld [vmem:[#allocation2] ss:$0 sm:$0xff] }
  0xe8   :  { %853 = vmatprep.subr.bf16.mxu0 %v1210_v61 }
  0xeb   :  { %854 = vmatpush2.bf16.msra.mxu0 %v1208_v62 }
 0x16e   :  { %v365_v6 = vpop.f32.mrf.mxu0 }
 0x16f   :  { %v366_v7 = vadd.f32 %v365_v6, %v164_v1 }
 0x170   :  { %v367_v8 = vpop.f32.mrf.mxu0 }
 0x171   :  { %v368_v9 = vadd.f32 %v367_v8, %v168_v2  ;;  %v372_v10 = vmax.f32 %v366_v7, 0.0 }
 0x172   :  { %v369_v11 = vpop.f32.mrf.mxu0 }
 0x173   :  { %v373_v12 = vmax.f32 %v368_v9, 0.0  ;;  %v374_v15 = vpack.c.bf16 %v372_v10, %v372_v10 }
 0x174   :  { %v370_v13 = vpop.f32.mrf.mxu0 }
 0x175   :  { %v375_v14 = vpack.c.bf16 %v373_v12, %v373_v12 }
 0x177   :  { %814 = vmatprep.mubr.bf16.mxu1 %v375_v14  ;;  %855 = vmatprep.mubr.bf16.mxu0 %v375_v14 }
 0x178   :  { %815 = vmatmul.mubr.bf16.vlgmr.msra.gmra.mxu1 %v374_v15  ;;  %856 = vmatmul.mubr.bf16.vlgmr.msra.gmra.mxu0 %v374_v15 }
 0x238   :  { %v816_v24 = vpop.f32.mrf.mxu1  ;;  %v857_v25 = vpop.f32.mrf.mxu0 }
 0x239   :  { %v817_v26 = vadd.f32 %v816_v24, %v445_v19  ;;  %v858_v28 = vadd.f32 %v857_v25, %v453_v20 }
 0x23a   :  { %v818_v29 = vpop.f32.mrf.mxu1  ;;  %v859_v3 = vpop.f32.mrf.mxu0 }
 0x23b   :  { %v864_v33 = vmax.f32 %v817_v26, 0.0  ;;  %v866_v34 = vmax.f32 %v858_v28, 0.0  ;;  %v819_v35 = vadd.f32 %v818_v29, %v449_v22  ;;  %v860_v36 = vadd.f32 %v859_v3, %v457_v23 }
 0x23c   :  { %v820_v37 = vpop.f32.mrf.mxu1  ;;  %v861_v38 = vpop.f32.mrf.mxu0 }
 0x23d   :  { %v890_v39 = vmul.f32 %v873_v27, %v864_v33  ;;  %v865_v40 = vmax.f32 %v819_v35, 0.0  ;;  %v867_v41 = vmax.f32 %v860_v36, 0.0  ;;  %v892_v4 = vmul.f32 %v881_v31, %v866_v34 }
 0x23e   :  { %v821_v42 = vpop.f32.mrf.mxu1  ;;  %v862_v43 = vpop.f32.mrf.mxu0 }
 0x23f   :  { %v891_v44 = vmul.f32 %v877_v30, %v865_v40  ;;  %v893_v45 = vmul.f32 %v885_v32, %v867_v41 }
 0x241   :  { %v905_v46 = vadd.f32 %v893_v45, %v892_v4  ;;  %v894_v47 = vadd.f32 %v891_v44, %v890_v39 }
 0x243   :  { %906 = vadd.xlane.f32.xlu1 %v905_v46 }
 0x2cc   :  { %v907_v48 = vpop.xlane.xlu1 %906 }
 0x2cd   :  { %v915_v49 = vadd.f32 %v1053_v5, %v907_v48 }
 0x2cf   :  { %v917_v50 = vsel %vm916_vm0, %v915_v49, 0.0 }
 0x2d0   :  { %918 = vadd.xlane.f32.xlu1 %v917_v50 }
 0x2d4   :  { %895 = vadd.xlane.f32.xlu1 %v894_v47 }
 0x359   :  { %v919_v51 = vpop.xlane.xlu1 %918 }
 0x35a   :  { %v920_v52 = vrot.slane %v919_v51, 4 }
 0x35c   :  { %v921_v53 = vadd.f32 %v920_v52, %v919_v51 }
 0x35d   :  { %v896_v59 = vpop.xlane.xlu1 %895 }
 0x35e   :  { %v922_v54 = vrot.slane %v921_v53, 2  ;;  %v904_v61 = vadd.f32 %v1052_v58, %v896_v59 }
 0x360   :  { %v923_v55 = vadd.f32 %v922_v54, %v921_v53 }
 0x362   :  { %v924_v56 = vrot.slane %v923_v55, 1 }
 0x364   :  { %v925_v57 = vadd.f32 %v924_v56, %v923_v55 }
 0x366   :  { %1054 = vpush %v925_v57 }
 0x397   :  { %s1055_s6 = spop %1054 }
 0x398   :  { %s929_s7 = smul.f32 0.125, %s1055_s6 }
 0x39a   :  { %v930_v60 = vstv %s929_s7 }
 0x39b   :  { %v931_v62 = vsub.f32 %v915_v49, %v930_v60 }
 0x39d   :  { %v932_v63 = vadd.f32 %v931_v62, %v904_v61 }
 0x39f   :  { %935 = vperm.xlu0 %1067, %v932_v63  }
 0x41a   :  { %v936_v0 = vpop.permute.xlu0 %935 }
 0x41b   :  { %938 = vst [vmem:[#allocation9] sm:$0xff] %v936_v0 }
 0x41c   :  { %1263 = shalt.err (!%p1260_p0)
}
 0x41d   :  { %948 = dma.vmem_to_hbm [thread:$0]  %s946_s18, 128, %s1409_s10, [#allocation6]  }
 0x41e   :  { %1276 = dma.done.wait [#allocation6], 128  }
 0x41f   :  { %1277 = vsyncadd [#allocation6], 4294967168 }
 0x420   :  { %952 = vsyncpa [#allocation5], 1 }
 0x421   :  { %953 = vsyncpa [#allocation8], 1 }
 0x422   :  { %954 = vsyncpa [#allocation6], 1 }

</bundles_post_ra>
